<compile_context>
chip_gen: v7x
topology: tpu7x:2x2x1
jax: 0.10.0
libtpu: 0.0.40
codegen_flags: <defaults>
</compile_context>

<pallas_src>
import jax
import jax.numpy as jnp
import numpy as np
from jax.experimental import pallas as pl
from jax.experimental.pallas import tpu as pltpu

_LANE = 128          # hidden widths padded to one full lane group for MXU alignment
_TILE_B_MAX = 4096   # batch rows per grid step (double-buffered; ~14 MiB VMEM total)


def _round_up(x, m):
    return (x + m - 1) // m * m


def _mlp_actor_kernel(obs_ref, gum_ref, w1_ref, b1_ref, w2_ref, b2_ref,
                      w3_ref, b3_ref, logits_ref, act_ref):
    """One batch tile: Linear->Tanh->Linear->Tanh->Linear + fused Gumbel-max sample."""
    x = obs_ref[...]                                               # (tile_b, obs_dim) bf16
    # hidden layer 1: bf16 MXU, f32 accumulate, tanh in bf16 (EUP-native on v6e/v7x)
    h = jnp.dot(x, w1_ref[...], preferred_element_type=jnp.float32) + b1_ref[...]
    h = jnp.tanh(h.astype(jnp.bfloat16))
    # hidden layer 2
    h = jnp.dot(h, w2_ref[...], preferred_element_type=jnp.float32) + b2_ref[...]
    h = jnp.tanh(h.astype(jnp.bfloat16))
    # output head: only the real act_dim columns are computed / stored (f32)
    logits = jnp.dot(h, w3_ref[...], preferred_element_type=jnp.float32) + b3_ref[...]
    logits_ref[...] = logits                                       # (tile_b, act_dim)

    # Categorical(logits).sample() via Gumbel-max; noise precomputed outside
    # (RNG stream differs from torch, as before).
    act_dim = logits.shape[-1]
    noisy = logits + gum_ref[...]
    max_val = jnp.max(noisy, axis=-1, keepdims=True)
    lane_idx = jax.lax.broadcasted_iota(jnp.int32, noisy.shape, 1)
    cand = jnp.where(noisy >= max_val, lane_idx, jnp.int32(act_dim))
    act_ref[...] = jnp.min(cand, axis=-1, keepdims=True)           # (tile_b, 1) int32


def _mlp_actor_pallas(obs, gumbel, params):
    """Runs the fused kernel; returns (logits[batch, act_dim], actions[batch])."""
    w1, b1, w2, b2, w3, b3 = params
    batch, obs_dim = obs.shape
    hp = w1.shape[1]           # padded hidden width (128)
    act_dim = w3.shape[1]      # real action count (unpadded output head)

    tile_b = min(_TILE_B_MAX, _round_up(batch, 8))
    padded_batch = _round_up(batch, tile_b)

    x = obs.astype(w1.dtype)                       # bf16: halves obs DMA bytes
    g = gumbel.astype(jnp.float32)
    if padded_batch != batch:
        pad = padded_batch - batch
        x = jnp.pad(x, ((0, pad), (0, 0)))
        g = jnp.pad(g, ((0, pad), (0, 0)))

    weight_bytes = sum(int(p.size) * p.dtype.itemsize for p in params)
    cost = pl.CostEstimate(
        flops=2 * padded_batch * (obs_dim * hp + hp * hp + hp * act_dim),
        transcendentals=padded_batch * 2 * hp,
        bytes_accessed=(padded_batch * obs_dim * x.dtype.itemsize    # obs read (bf16)
                        + padded_batch * act_dim * 4                 # gumbel read
                        + padded_batch * act_dim * 4                 # logits write
                        + padded_batch * 4                           # actions write
                        + weight_bytes),
    )

    grid_spec = pltpu.PrefetchScalarGridSpec(
        num_scalar_prefetch=0,
        grid=(padded_batch // tile_b,),
        in_specs=[
            pl.BlockSpec((tile_b, obs_dim), lambda i: (i, 0)),   # batch-tiled obs
            pl.BlockSpec((tile_b, act_dim), lambda i: (i, 0)),   # batch-tiled gumbel
            pl.BlockSpec(w1.shape, lambda i: (0, 0)),            # weights stay resident
            pl.BlockSpec(b1.shape, lambda i: (0, 0)),
            pl.BlockSpec(w2.shape, lambda i: (0, 0)),
            pl.BlockSpec(b2.shape, lambda i: (0, 0)),
            pl.BlockSpec(w3.shape, lambda i: (0, 0)),
            pl.BlockSpec(b3.shape, lambda i: (0, 0)),
        ],
        out_specs=[
            pl.BlockSpec((tile_b, act_dim), lambda i: (i, 0)),   # only real logit cols
            pl.BlockSpec((tile_b, 1), lambda i: (i, 0)),         # sampled actions
        ],
    )

    logits_p, actions_p = pl.pallas_call(
        _mlp_actor_kernel,
        out_shape=(jax.ShapeDtypeStruct((padded_batch, act_dim), jnp.float32),
                   jax.ShapeDtypeStruct((padded_batch, 1), jnp.int32)),
        grid_spec=grid_spec,
        compiler_params=pltpu.CompilerParams(
            dimension_semantics=("parallel",),       # batch tiles are independent
            vmem_limit_bytes=32 * 1024 * 1024),
        cost_estimate=cost,
    )(x, g, w1, b1, w2, b2, w3, b3)
    return logits_p[:batch], actions_p[:batch, 0]


@jax.jit
def mlp_actor_discrete_forward(obs, params, key):
    """Equivalent of MLPActorDiscrete.forward: sample actions; also return logits."""
    act_dim = params[4].shape[1]
    batch = obs.shape[0]
    # Gumbel noise for the real (batch, act_dim) entries only (padding-independent).
    gumbel = jax.random.gumbel(key, (batch, act_dim), jnp.float32)
    logits, actions = _mlp_actor_pallas(obs, gumbel, params)
    return actions, logits


def init_params(key, obs_dim, hidden_sizes, act_dim, *, dtype=jnp.bfloat16):
    """Matches init_weights: orthogonal weights (gain sqrt(2) hidden, 0.01 output),
    zero biases.  Hidden dims are zero-padded to 128 lanes once here (padding
    contributes exactly zero); the output head stays at act_dim columns."""
    sizes = [obs_dim] + list(hidden_sizes) + [act_dim]
    gains = [2.0 ** 0.5] * len(hidden_sizes) + [0.01]
    params = []
    for i, gain in enumerate(gains):
        key, wkey = jax.random.split(key)
        fan_in, fan_out = sizes[i], sizes[i + 1]
        w = jax.nn.initializers.orthogonal(scale=gain)(
            wkey, (fan_in, fan_out), jnp.float32)
        is_last = (i == len(gains) - 1)
        fan_in_p = fan_in if i == 0 else _round_up(fan_in, _LANE)   # obs stays unpadded
        fan_out_p = fan_out if is_last else _round_up(fan_out, _LANE)
        w_p = jnp.zeros((fan_in_p, fan_out_p), jnp.float32).at[:fan_in, :fan_out].set(w)
        b_p = jnp.zeros((1, fan_out_p), jnp.float32)
        params += [w_p.astype(dtype), b_p]
    return tuple(params)


def _ref_logits(obs, params):
    """Pure-JAX reference for the logits path (same padded bf16 weights, f32 math)."""
    w1, b1, w2, b2, w3, b3 = [p.astype(jnp.float32) for p in params]
    h = jnp.tanh(obs @ w1 + b1)
    h = jnp.tanh(h @ w2 + b2)
    return h @ w3 + b3


if __name__ == "__main__":
    # Small shapes consistent with the module: obs_dim=16, hidden=[32,32], act_dim=8.
    batch, obs_dim, hidden_sizes, act_dim = 2, 16, [32, 32], 8

    root = jax.random.PRNGKey(0)
    pkey, okey, skey = jax.random.split(root, 3)

    params = init_params(pkey, obs_dim, hidden_sizes, act_dim)
    obs = jax.random.normal(okey, (batch, obs_dim), jnp.float32)

    actions, logits = mlp_actor_discrete_forward(obs, params, skey)
    jax.block_until_ready((actions, logits))

    assert actions.shape == (batch,)
    assert logits.shape == (batch, act_dim)
    assert bool(jnp.all((actions >= 0) & (actions < act_dim)))

    ref = _ref_logits(obs, params)
    np.testing.assert_allclose(np.asarray(logits), np.asarray(ref),
                               atol=5e-2, rtol=5e-2)

    # TODO(synk): non-forward MLPActorDiscrete methods (log_prob, entropy, KL) are
    # not part of forward() and are not implemented here.
    print("KERNEL_OK")
</pallas_src>

<mosaic_0001>
module attributes {stable_mosaic.version = 11 : i64} {
  func.func @_mlp_actor_kernel(%arg0: i32, %arg1: memref<8x16xbf16, #tpu.memory_space<vmem>>, %arg2: memref<8x8xf32, #tpu.memory_space<vmem>>, %arg3: memref<16x128xbf16, #tpu.memory_space<vmem>>, %arg4: memref<1x128xf32, #tpu.memory_space<vmem>>, %arg5: memref<128x128xbf16, #tpu.memory_space<vmem>>, %arg6: memref<1x128xf32, #tpu.memory_space<vmem>>, %arg7: memref<128x8xbf16, #tpu.memory_space<vmem>>, %arg8: memref<1x8xf32, #tpu.memory_space<vmem>>, %arg9: memref<8x8xf32, #tpu.memory_space<vmem>>, %arg10: memref<8x1xi32, #tpu.memory_space<vmem>>) attributes {dimension_semantics = [#tpu.dimension_semantics<parallel>], iteration_bounds = array<i64: 1>, scalar_prefetch = 0 : i64, scratch_operands = 0 : i64, tpu.core_type = #tpu.core_type<tc>, window_params = [{transform_indices = @transform_0, window_bounds = array<i64: 8, 16>}, {transform_indices = @transform_1, window_bounds = array<i64: 8, 8>}, {pipeline_mode = #tpu.pipeline_mode<synchronous>, transform_indices = @transform_2, window_bounds = array<i64: 16, 128>}, {pipeline_mode = #tpu.pipeline_mode<synchronous>, transform_indices = @transform_3, window_bounds = array<i64: 1, 128>}, {pipeline_mode = #tpu.pipeline_mode<synchronous>, transform_indices = @transform_4, window_bounds = array<i64: 128, 128>}, {pipeline_mode = #tpu.pipeline_mode<synchronous>, transform_indices = @transform_5, window_bounds = array<i64: 1, 128>}, {pipeline_mode = #tpu.pipeline_mode<synchronous>, transform_indices = @transform_6, window_bounds = array<i64: 128, 8>}, {pipeline_mode = #tpu.pipeline_mode<synchronous>, transform_indices = @transform_7, window_bounds = array<i64: 1, 8>}, {transform_indices = @transform_8, window_bounds = array<i64: 8, 8>}, {transform_indices = @transform_9, window_bounds = array<i64: 8, 1>}]} {
    %c0 = arith.constant 0 : index
    %c0_0 = arith.constant 0 : index
    %0 = vector.load %arg1[%c0, %c0_0] : memref<8x16xbf16, #tpu.memory_space<vmem>>, vector<8x16xbf16>
    %c0_1 = arith.constant 0 : index
    %c0_2 = arith.constant 0 : index
    %1 = vector.load %arg3[%c0_1, %c0_2] : memref<16x128xbf16, #tpu.memory_space<vmem>>, vector<16x128xbf16>
    %cst = arith.constant dense<0.000000e+00> : vector<8x128xf32>
    %2 = tpu.matmul %0, %1, %cst {dimension_numbers = #tpu.dot_dimension_numbers<[1], [0], [0], [1], [0, 0, 1, 1], [], []>} : vector<8x16xbf16>, vector<16x128xbf16>, vector<8x128xf32> -> vector<8x128xf32>
    %c0_3 = arith.constant 0 : index
    %c0_4 = arith.constant 0 : index
    %3 = vector.load %arg4[%c0_3, %c0_4] : memref<1x128xf32, #tpu.memory_space<vmem>>, vector<1x128xf32>
    %4 = vector.broadcast %3 : vector<1x128xf32> to vector<8x128xf32>
    %5 = arith.addf %2, %4 : vector<8x128xf32>
    %6 = arith.truncf %5 : vector<8x128xf32> to vector<8x128xbf16>
    %7 = math.tanh %6 : vector<8x128xbf16>
    %c0_5 = arith.constant 0 : index
    %c0_6 = arith.constant 0 : index
    %8 = vector.load %arg5[%c0_5, %c0_6] : memref<128x128xbf16, #tpu.memory_space<vmem>>, vector<128x128xbf16>
    %cst_7 = arith.constant dense<0.000000e+00> : vector<8x128xf32>
    %9 = tpu.matmul %7, %8, %cst_7 {dimension_numbers = #tpu.dot_dimension_numbers<[1], [0], [0], [1], [0, 0, 1, 1], [], []>} : vector<8x128xbf16>, vector<128x128xbf16>, vector<8x128xf32> -> vector<8x128xf32>
    %c0_8 = arith.constant 0 : index
    %c0_9 = arith.constant 0 : index
    %10 = vector.load %arg6[%c0_8, %c0_9] : memref<1x128xf32, #tpu.memory_space<vmem>>, vector<1x128xf32>
    %11 = vector.broadcast %10 : vector<1x128xf32> to vector<8x128xf32>
    %12 = arith.addf %9, %11 : vector<8x128xf32>
    %13 = arith.truncf %12 : vector<8x128xf32> to vector<8x128xbf16>
    %14 = math.tanh %13 : vector<8x128xbf16>
    %c0_10 = arith.constant 0 : index
    %c0_11 = arith.constant 0 : index
    %15 = vector.load %arg7[%c0_10, %c0_11] : memref<128x8xbf16, #tpu.memory_space<vmem>>, vector<128x8xbf16>
    %cst_12 = arith.constant dense<0.000000e+00> : vector<8x8xf32>
    %16 = tpu.matmul %14, %15, %cst_12 {dimension_numbers = #tpu.dot_dimension_numbers<[1], [0], [0], [1], [0, 0, 1, 1], [], []>} : vector<8x128xbf16>, vector<128x8xbf16>, vector<8x8xf32> -> vector<8x8xf32>
    %c0_13 = arith.constant 0 : index
    %c0_14 = arith.constant 0 : index
    %17 = vector.load %arg8[%c0_13, %c0_14] : memref<1x8xf32, #tpu.memory_space<vmem>>, vector<1x8xf32>
    %18 = vector.broadcast %17 : vector<1x8xf32> to vector<8x8xf32>
    %19 = arith.addf %16, %18 : vector<8x8xf32>
    %c0_15 = arith.constant 0 : index
    %c0_16 = arith.constant 0 : index
    %20 = vector.load %arg9[%c0_15, %c0_16] : memref<8x8xf32, #tpu.memory_space<vmem>>, vector<8x8xf32>
    tpu.vector_store %arg9[%c0_15, %c0_16], %19 {strides = array<i32>} : memref<8x8xf32, #tpu.memory_space<vmem>>, vector<8x8xf32>,
    %c0_17 = arith.constant 0 : index
    %c0_18 = arith.constant 0 : index
    %21 = vector.load %arg2[%c0_17, %c0_18] : memref<8x8xf32, #tpu.memory_space<vmem>>, vector<8x8xf32>
    %22 = arith.addf %19, %21 : vector<8x8xf32>
    %cst_19 = arith.constant dense<0xFF800000> : vector<8xf32>
    %23 = vector.multi_reduction <maximumf>, %22, %cst_19 [1] : vector<8x8xf32> to vector<8xf32>
    %24 = vector.shape_cast %23 : vector<8xf32> to vector<8x1xf32>
    %25 = tpu.iota {dimensions = array<i32: 1>} : vector<8x8xi32>
    %26 = vector.broadcast %24 : vector<8x1xf32> to vector<8x8xf32>
    %27 = arith.cmpf oge, %22, %26 : vector<8x8xf32>
    %c8_i32 = arith.constant 8 : i32
    %28 = vector.broadcast %c8_i32 : i32 to vector<8x8xi32>
    %29 = arith.select %27, %25, %28 : vector<8x8xi1>, vector<8x8xi32>
    %cst_20 = arith.constant dense<2147483647> : vector<8xi32>
    %30 = vector.multi_reduction <minsi>, %29, %cst_20 [1] : vector<8x8xi32> to vector<8xi32>
    %31 = vector.shape_cast %30 : vector<8xi32> to vector<8x1xi32>
    %c0_21 = arith.constant 0 : index
    %c0_22 = arith.constant 0 : index
    %32 = vector.load %arg10[%c0_21, %c0_22] : memref<8x1xi32, #tpu.memory_space<vmem>>, vector<8x1xi32>
    tpu.vector_store %arg10[%c0_21, %c0_22], %31 {strides = array<i32>} : memref<8x1xi32, #tpu.memory_space<vmem>>, vector<8x1xi32>,
    return
  }
  func.func @transform_0(%arg0: i32) -> (i32, i32) {
    %c0_i32 = arith.constant 0 : i32
    %c0_i32_0 = arith.constant 0 : i32
    return %arg0, %c0_i32 : i32, i32
  }
  func.func @transform_1(%arg0: i32) -> (i32, i32) {
    %c0_i32 = arith.constant 0 : i32
    %c0_i32_0 = arith.constant 0 : i32
    return %arg0, %c0_i32 : i32, i32
  }
  func.func @transform_2(%arg0: i32) -> (i32, i32) {
    %c0_i32 = arith.constant 0 : i32
    %c0_i32_0 = arith.constant 0 : i32
    %c0_i32_1 = arith.constant 0 : i32
    return %c0_i32, %c0_i32_0 : i32, i32
  }
  func.func @transform_3(%arg0: i32) -> (i32, i32) {
    %c0_i32 = arith.constant 0 : i32
    %c0_i32_0 = arith.constant 0 : i32
    %c0_i32_1 = arith.constant 0 : i32
    return %c0_i32, %c0_i32_0 : i32, i32
  }
  func.func @transform_4(%arg0: i32) -> (i32, i32) {
    %c0_i32 = arith.constant 0 : i32
    %c0_i32_0 = arith.constant 0 : i32
    %c0_i32_1 = arith.constant 0 : i32
    return %c0_i32, %c0_i32_0 : i32, i32
  }
  func.func @transform_5(%arg0: i32) -> (i32, i32) {
    %c0_i32 = arith.constant 0 : i32
    %c0_i32_0 = arith.constant 0 : i32
    %c0_i32_1 = arith.constant 0 : i32
    return %c0_i32, %c0_i32_0 : i32, i32
  }
  func.func @transform_6(%arg0: i32) -> (i32, i32) {
    %c0_i32 = arith.constant 0 : i32
    %c0_i32_0 = arith.constant 0 : i32
    %c0_i32_1 = arith.constant 0 : i32
    return %c0_i32, %c0_i32_0 : i32, i32
  }
  func.func @transform_7(%arg0: i32) -> (i32, i32) {
    %c0_i32 = arith.constant 0 : i32
    %c0_i32_0 = arith.constant 0 : i32
    %c0_i32_1 = arith.constant 0 : i32
    return %c0_i32, %c0_i32_0 : i32, i32
  }
  func.func @transform_8(%arg0: i32) -> (i32, i32) {
    %c0_i32 = arith.constant 0 : i32
    %c0_i32_0 = arith.constant 0 : i32
    return %arg0, %c0_i32 : i32, i32
  }
  func.func @transform_9(%arg0: i32) -> (i32, i32) {
    %c0_i32 = arith.constant 0 : i32
    %c0_i32_0 = arith.constant 0 : i32
    return %arg0, %c0_i32 : i32, i32
  }
}

</mosaic_0001>

<bundles_post_ra>
// kernel: mlp_actor_discrete_forward.1
= control target key start
LH: loop header
LB: loop body
LE: loop exit
PB: predicated region body
PF: predicated region fallthrough
CT: control target
= control target key end

     0   :  { %v464_v0 = vmov 0.0   ;;  %vm465_vm0 = vmmov 0   ;;  %vm48_vm1 = vcmask 130048   ;;  %vm318_vm2 = vcmask 64512   ;;  %s608_s2 = inlined_call_operand.vmem [shape: bf16[16,128], index: 2, kind: input, shape index: {}]   ;;  %s609_s0 = inlined_call_operand.vmem [shape: bf16[8,16], index: 0, kind: input, shape index: {}]   ;;  %s610_s4 = inlined_call_operand.vmem [shape: bf16[128,128], index: 4, kind: input, shape index: {}]   ;;  %s611_s6 = inlined_call_operand.vmem [shape: bf16[128,8], index: 6, kind: input, shape index: {}]   ;;  %s612_s3 = inlined_call_operand.vmem [shape: f32[1,128], index: 3, kind: input, shape index: {}]   ;;  %s613_s5 = inlined_call_operand.vmem [shape: f32[1,128], index: 5, kind: input, shape index: {}]   ;;  %s614_s7 = inlined_call_operand.vmem [shape: f32[1,8], index: 7, kind: input, shape index: {}]   ;;  %s615_s1 = inlined_call_operand.vmem [shape: f32[8,8], index: 1, kind: input, shape index: {}]   ;;  %s616_s8 = inlined_call_operand.vmem [shape: f32[8,8], index: 8, kind: output, shape index: {0}]   ;;  %s617_s9 = inlined_call_operand.vmem [shape: s32[8,1], index: 9, kind: output, shape index: {1}]  }
   0x1   :  { %395 = vmatprep.subr.bf16.mxu0 %v464_v0  ;;  %v443_v1 = vld [vmem:[%s608_s2] sm:$0xff]   ;;  %397 = vmatprep.mubr.msk.bf16.mxu0 %vm465_vm0, %v464_v0  ;;  %v445_v4 = vld [vmem:[%s610_s4 + $0x8] sm:$0xff]   ;;  %v446_v5 = vld [vmem:[%s610_s4 + $0x10] sm:$0xff]   ;;  %v325_v44 = vlaneseq  ;;  %vm344_vm5 = vcmask 7168  }
   0x2   :  { %v32_v2 = vld [vmem:[%s609_s0] sm:$0xf]  ;;  %401 = vmatprep.subr.bf16.mxu1 %v464_v0  ;;  %417 = vmatprep.mubr.msk.bf16.mxu1 %vm465_vm0, %v464_v0  ;;  %v447_v6 = vld [vmem:[%s610_s4 + $0x18] sm:$0xff]   ;;  %v449_v8 = vld [vmem:[%s610_s4 + $0x28] sm:$0xff]  }
   0x3   :  { %396 = vmatpush3.bf16.msra.mxu0 %v443_v1  ;;  %v444_v3 = vld [vmem:[%s610_s4] sm:$0xff]   ;;  %v450_v9 = vld [vmem:[%s610_s4 + $0x30] sm:$0xff]   ;;  %v451_v10 = vld [vmem:[%s610_s4 + $0x38] sm:$0xff]   ;;  %v326_v45 = vand.u32 127, %v325_v44 }
   0x4   :  { %421 = vmatprep.subr.bf16.mxu0 %v464_v0  ;;  %402 = vmatpush3.bf16.msra.mxu1 %v444_v3  ;;  %v448_v7 = vld [vmem:[%s610_s4 + $0x20] sm:$0xff]   ;;  %v453_v12 = vld [vmem:[%s611_s6 + $0x8] sm:$0xff]   ;;  %v454_v13 = vld [vmem:[%s611_s6 + $0x10] sm:$0xff]  }
   0x5   :  { %403 = vmatprep.subr.bf16.mxu1 %v464_v0  ;;  %v452_v11 = vld [vmem:[%s611_s6] sm:$0xff]   ;;  %v455_v14 = vld [vmem:[%s611_s6 + $0x18] sm:$0xff]   ;;  %v457_v24 = vld [vmem:[%s611_s6 + $0x28] sm:$0xff]  }
   0x6   :  { %398 = vmatmul.mubr.msk.bf16.vlgmr.msra.gmra.mrb[0].mxu0 %vm48_vm1, %v32_v2  ;;  %v354_v15 = vld [vmem:[%s612_s3] ss:$0 sm:$0xff]  ;;  %v458_v25 = vld [vmem:[%s611_s6 + $0x30] sm:$0xff]   ;;  %v459_v26 = vld [vmem:[%s611_s6 + $0x38] sm:$0xff]  }
   0x7   :  { %437 = vmatprep.mubr.msk.bf16.mxu0 %vm465_vm0, %v464_v0  ;;  %422 = vmatpush3.bf16.msra.mxu0 %v452_v11  ;;  %v456_v23 = vld [vmem:[%s611_s6 + $0x20] sm:$0xff]  }
   0x8   :  { %404 = vmatpush3.bf16.msra.mxu1 %v445_v4  ;;  %423 = vmatprep.subr.bf16.mxu0 %v464_v0  ;;  %v357_v27 = vld [vmem:[%s613_s5] ss:$0 sm:$0xff] }
   0x9   :  { %405 = vmatprep.subr.bf16.mxu1 %v464_v0  ;;  %v366_v35 = vld [vmem:[%s614_s7] ss:$0 sm:$0xff] }
   0xa   :  { %v320_v37 = vld [vmem:[%s615_s1] sm:$0xff] }
   0xb   :  { %424 = vmatpush3.bf16.msra.mxu0 %v453_v12 }
   0xc   :  { %406 = vmatpush3.bf16.msra.mxu1 %v446_v5  ;;  %425 = vmatprep.subr.bf16.mxu0 %v464_v0 }
   0xd   :  { %407 = vmatprep.subr.bf16.mxu1 %v464_v0 }
   0xf   :  { %426 = vmatpush3.bf16.msra.mxu0 %v454_v13 }
  0x10   :  { %408 = vmatpush3.bf16.msra.mxu1 %v447_v6  ;;  %427 = vmatprep.subr.bf16.mxu0 %v464_v0 }
  0x11   :  { %409 = vmatprep.subr.bf16.mxu1 %v464_v0 }
  0x13   :  { %428 = vmatpush3.bf16.msra.mxu0 %v455_v14 }
  0x14   :  { %410 = vmatpush3.bf16.msra.mxu1 %v448_v7  ;;  %429 = vmatprep.subr.bf16.mxu0 %v464_v0 }
  0x15   :  { %411 = vmatprep.subr.bf16.mxu1 %v464_v0 }
  0x17   :  { %430 = vmatpush3.bf16.msra.mxu0 %v456_v23 }
  0x18   :  { %412 = vmatpush3.bf16.msra.mxu1 %v449_v8  ;;  %431 = vmatprep.subr.bf16.mxu0 %v464_v0 }
  0x19   :  { %413 = vmatprep.subr.bf16.mxu1 %v464_v0 }
  0x1b   :  { %432 = vmatpush3.bf16.msra.mxu0 %v457_v24 }
  0x1c   :  { %414 = vmatpush3.bf16.msra.mxu1 %v450_v9  ;;  %433 = vmatprep.subr.bf16.mxu0 %v464_v0 }
  0x1d   :  { %415 = vmatprep.subr.bf16.mxu1 %v464_v0 }
  0x1f   :  { %434 = vmatpush3.bf16.msra.mxu0 %v458_v25 }
  0x20   :  { %416 = vmatpush3.bf16.msra.mxu1 %v451_v10  ;;  %435 = vmatprep.subr.bf16.mxu0 %v464_v0 }
  0x23   :  { %436 = vmatpush3.bf16.msra.mxu0 %v459_v26 }
  0xd9   :  { %v86_v16 = vpop.f32.mrb[0].mxu0 }
  0xda   :  { %v87_v17 = vadd.f32 %v354_v15, %v86_v16  ;;  %v399_v18 = vpop.f32.mrb[1].mxu0 }
  0xdb   :  { %v89_v19 = vpop.f32.mrb[2].mxu0 }
  0xdc   :  { %v92_v20 = vpack.c.bf16 %v87_v17, %v87_v17  ;;  %v400_v21 = vpop.f32.mrb[3].mxu0 }
  0xde   :  { %460 = vtanh.bf16 %v92_v20 }
  0xe9   :  { %v461_v22 = vpop.eup %460 }
  0xea   :  { %418 = vmatmul.mubr.bf16.vlgmr.msra.gmra.mrb[0].mxu1 %v461_v22 }
 0x1bd   :  { %v199_v28 = vpop.f32.mrb[0].mxu1 }
 0x1be   :  { %v200_v29 = vadd.f32 %v357_v27, %v199_v28  ;;  %v419_v30 = vpop.f32.mrb[1].mxu1 }
 0x1bf   :  { %v202_v31 = vpop.f32.mrb[2].mxu1 }
 0x1c0   :  { %v205_v32 = vpack.c.bf16 %v200_v29, %v200_v29  ;;  %v420_v33 = vpop.f32.mrb[3].mxu1 }
 0x1c2   :  { %462 = vtanh.bf16 %v205_v32 }
 0x1cd   :  { %v463_v34 = vpop.eup %462 }
 0x1ce   :  { %438 = vmatmul.mubr.bf16.vlgmr.msra.gmra.mrb[4].mxu0 %v463_v34 }
 0x2a1   :  { %v312_v36 = vpop.f32.mrb[4].mxu0 }
 0x2a2   :  { %v313_v38 = vadd.f32 %v366_v35, %v312_v36  ;;  %v439_v39 = vpop.f32.mrb[5].mxu0 }
 0x2a3   :  { %v315_v40 = vpop.f32.mrb[6].mxu0 }
 0x2a4   :  { %v440_v41 = vpop.f32.mrb[7].mxu0  ;;  %v321_v42 = vadd.f32 %v320_v37, %v313_v38  ;;  %319 = vst.msk [vmem:[%s616_s8] sm:$0xff] %vm318_vm2, %v313_v38 }
 0x2a6   :  { %v322_v43 = vsel %vm318_vm2, %v321_v42, -inf }
 0x2a7   :  { %323 = vmax.xlane.f32.xlu0 %v322_v43 }
 0x334   :  { %v324_v46 = vpop.xlane.xlu0 %323 }
 0x335   :  { %vm327_vm3 = vcmp.ge.f32.partialorder %v321_v42, %v324_v46 }
 0x336   :  { %v328_v47 = vsel %vm327_vm3, %v326_v45, 8 }
 0x337   :  { %v329_v48 = vsel %vm318_vm2, %v328_v47, 2147483647 }
 0x338   :  { %v331_v49 = vshra.s32 %v329_v48, 16  ;;  %v330_v51 = vand.u32 65535, %v329_v48 }
 0x33a   :  { %v333_v50 = vcvt.s32.f32 %v331_v49  ;;  %v332_v53 = vcvt.s32.f32 %v330_v51 }
 0x33c   :  { %334 = vmin.xlane.f32.xlu0 %v333_v50 }
 0x3c9   :  { %v335_v52 = vpop.xlane.xlu0 %334 }
 0x3ca   :  { %vm336_vm4 = vcmp.eq.f32.partialorder %v333_v50, %v335_v52  ;;  %v341_v55 = vcvt.f32.s32 %v335_v52 }
 0x3cb   :  { %v337_v54 = vsel %vm336_vm4, %v332_v53, inf }
 0x3cc   :  { %338 = vmin.xlane.f32.xlu1 %v337_v54  ;;  %v342_v57 = vshll.u32 %v341_v55, 16 }
 0x459   :  { %v339_v56 = vpop.xlane.xlu1 %338 }
 0x45a   :  { %v340_v58 = vcvt.f32.s32 %v339_v56 }
 0x45c   :  { %v343_v59 = vadd.s32 %v342_v57, %v340_v58 }
 0x45e   :  { %345 = vst.msk [vmem:[%s617_s9] sm:$0xff] %vm344_vm5, %v343_v59 }

</bundles_post_ra>
